<compile_context>
chip_gen: v7x
topology: tpu7x:2x2x1
jax: 0.10.0
libtpu: 0.0.40
codegen_flags: <defaults>
</compile_context>

<pallas_src>
import jax
import jax.numpy as jnp
from jax import lax
from jax.experimental import pallas as pl
from jax.experimental.pallas import tpu as pltpu


# --------------------------------------------------------------------------------------
# Kernels
# --------------------------------------------------------------------------------------
def _encoder_kernel(x_ref, w_ref, b_ref, h_ref, acc_ref):
    # x_ref:  (1, TILE_D)  input pixels (f32, cast to weight dtype for the MXU)
    # w_ref:  (R, TILE_D)  encoder weight tile, torch (out, in) layout, bf16, lane-dense
    # b_ref:  (1, R)       encoder bias (f32)
    # h_ref:  (1, R)       sigmoid(encoder) output (f32)
    # acc_ref:(1, R)       f32 accumulator scratch (resident across the D reduction)
    k = pl.program_id(0)

    @pl.when(k == 0)
    def _init():
        acc_ref[...] = jnp.zeros_like(acc_ref)

    x = x_ref[...].astype(w_ref.dtype)
    # Contract last dims: (1, TILE_D) . (R, TILE_D) -> (1, R).  No transpose anywhere.
    acc_ref[...] += lax.dot_general(
        x, w_ref[...],
        dimension_numbers=(((1,), (1,)), ((), ())),
        preferred_element_type=jnp.float32,
    )

    @pl.when(k == pl.num_programs(0) - 1)
    def _finalize():
        z = acc_ref[...] + b_ref[...]
        # sigmoid: exp and approx reciprocal both land on the EUP slot.
        h_ref[...] = pl.reciprocal(1.0 + jnp.exp(-z), approx=True)


def _decoder_kernel(h_ref, w_ref, b_ref, o_ref):
    # h_ref: (1, R)        encoded row (f32)
    # w_ref: (R, TILE_D)   decoder weight tile, pre-transposed once at init, bf16
    # b_ref: (1, TILE_D)   decoder bias tile (f32)
    # o_ref: (1, TILE_D)   lane-dense output tile
    h = h_ref[...].astype(w_ref.dtype)
    y = jnp.dot(h, w_ref[...], preferred_element_type=jnp.float32) + b_ref[...]
    o_ref[...] = y.astype(o_ref.dtype)


# --------------------------------------------------------------------------------------
# Wrapper
# --------------------------------------------------------------------------------------
_VMEM_LIMIT = 32 * 1024 * 1024  # explicit scoped-VMEM budget; v7x physical is only 64 MiB


def _pick_tile_d(d, max_tile=1024):
    """Largest 128-multiple tile <= max_tile that divides D; else the full D block."""
    if d <= max_tile:
        return d
    for t in range(max_tile, 127, -128):
        if d % t == 0:
            return t
    return d  # fallback: single full-D block (still correct, just untiled)


def pixel_encoder_forward(x, w_enc, b_enc, w_dec_t, b_dec, *, tile_d=None):
    """Forward pass of SimplePixelEncoder.

    x:       any shape with prod(shape) == D = width*height (module flattens to (1, D)).
    w_enc:   (R, D)  encoder weight, torch (out, in) layout — used as-is, no transpose.
    b_enc:   (R,)    encoder bias.
    w_dec_t: (R, D)  decoder weight pre-transposed ONCE at init (torch layout is (D, R)).
    b_dec:   (D,)    decoder bias.
    """
    original_shape = x.shape
    d = x.size
    r = b_enc.shape[0]
    assert w_enc.shape == (r, d), (w_enc.shape, (r, d))
    assert w_dec_t.shape == (r, d), (w_dec_t.shape, (r, d))

    flat = x.reshape(1, d)
    b1 = b_enc.reshape(1, r).astype(jnp.float32)
    b2 = b_dec.reshape(1, d).astype(jnp.float32)

    td = tile_d if tile_d is not None else _pick_tile_d(d)
    assert d % td == 0
    n_tiles = d // td

    # ---- Phase 1: encoder — reduce over D tiles into a (1, R) f32 accumulator -------
    h = pl.pallas_call(
        _encoder_kernel,
        out_shape=jax.ShapeDtypeStruct((1, r), jnp.float32),
        grid_spec=pltpu.PrefetchScalarGridSpec(
            num_scalar_prefetch=0,
            grid=(n_tiles,),
            in_specs=[
                pl.BlockSpec((1, td), lambda k: (0, k)),   # x tile (lane-dense)
                pl.BlockSpec((r, td), lambda k: (0, k)),   # W_enc tile (lane-dense)
                pl.BlockSpec((1, r), lambda k: (0, 0)),    # bias (resident)
            ],
            out_specs=pl.BlockSpec((1, r), lambda k: (0, 0)),
            scratch_shapes=[pltpu.VMEM((1, r), jnp.float32)],
        ),
        compiler_params=pltpu.CompilerParams(
            dimension_semantics=("arbitrary",),            # reduction axis
            vmem_limit_bytes=_VMEM_LIMIT,
        ),
    )(flat, w_enc, b1)

    # ---- Phase 2: decoder — parallel over lane-dense D output tiles ------------------
    out = pl.pallas_call(
        _decoder_kernel,
        out_shape=jax.ShapeDtypeStruct((1, d), x.dtype),
        grid_spec=pltpu.PrefetchScalarGridSpec(
            num_scalar_prefetch=0,
            grid=(n_tiles,),
            in_specs=[
                pl.BlockSpec((1, r), lambda j: (0, 0)),    # h (resident, no re-fetch)
                pl.BlockSpec((r, td), lambda j: (0, j)),   # W_dec^T tile (lane-dense)
                pl.BlockSpec((1, td), lambda j: (0, j)),   # bias tile
            ],
            out_specs=pl.BlockSpec((1, td), lambda j: (0, j)),
        ),
        compiler_params=pltpu.CompilerParams(
            dimension_semantics=("parallel",),             # shards across TCs on v7x
            vmem_limit_bytes=_VMEM_LIMIT,
        ),
    )(h, w_dec_t, b2)

    return out.reshape(original_shape)


# --------------------------------------------------------------------------------------
# Parameter init / one-time preparation
# --------------------------------------------------------------------------------------
def init_params(key, width, height, repr_size, dtype=jnp.float32):
    """torch.nn.Linear-style init: U(-1/sqrt(fan_in), 1/sqrt(fan_in)), torch layouts."""
    d = width * height
    k1, k2, k3, k4 = jax.random.split(key, 4)
    bound_e = 1.0 / (d ** 0.5)
    bound_d = 1.0 / (repr_size ** 0.5)
    w_enc = jax.random.uniform(k1, (repr_size, d), dtype, -bound_e, bound_e)  # (R, D)
    b_enc = jax.random.uniform(k2, (repr_size,), dtype, -bound_e, bound_e)
    w_dec = jax.random.uniform(k3, (d, repr_size), dtype, -bound_d, bound_d)  # (D, R)
    b_dec = jax.random.uniform(k4, (d,), dtype, -bound_d, bound_d)
    return w_enc, b_enc, w_dec, b_dec


def prepare_params(w_enc, b_enc, w_dec, b_dec, weight_dtype=jnp.bfloat16):
    """One-time (persisted) prep: narrow weight dtype and pre-transpose the decoder
    weight to (R, D) so no per-forward transposes touch HBM."""
    w_enc_k = w_enc.astype(weight_dtype)        # (R, D), lane dim = D
    w_dec_t = w_dec.T.astype(weight_dtype)      # (R, D), lane dim = D
    return w_enc_k, b_enc, w_dec_t, b_dec


# --------------------------------------------------------------------------------------
# Demo / self-check
# --------------------------------------------------------------------------------------
if __name__ == "__main__":
    width, height, repr_size = 16, 16, 32

    key = jax.random.PRNGKey(0)
    k_params, k_input = jax.random.split(key)

    w_enc, b_enc, w_dec, b_dec = init_params(k_params, width, height, repr_size)
    w_enc_k, b_enc_k, w_dec_t, b_dec_k = prepare_params(w_enc, b_enc, w_dec, b_dec)

    # NCHW input (1, 1, H, W); forward flattens to (1, W*H) like the PyTorch module.
    x = jax.random.uniform(k_input, (1, 1, height, width), jnp.float32)

    out = pixel_encoder_forward(x, w_enc_k, b_enc_k, w_dec_t, b_dec_k)
    out = jax.block_until_ready(out)
    assert out.shape == x.shape

    # Reference 1: same stored (bf16) weights, f32 math, matching the kernel's casts.
    we = w_enc_k.astype(jnp.float32)
    wd = w_dec_t.astype(jnp.float32)
    xq = x.reshape(1, -1).astype(jnp.bfloat16).astype(jnp.float32)
    h_ref = jax.nn.sigmoid(xq @ we.T + b_enc)
    hq = h_ref.astype(jnp.bfloat16).astype(jnp.float32)
    ref = (hq @ wd + b_dec).reshape(x.shape)
    assert jnp.allclose(out, ref, atol=2e-2, rtol=2e-2), float(jnp.max(jnp.abs(out - ref)))

    # Reference 2: original full-f32 torch-layout weights (semantic check, looser tol
    # because stored weights are bf16).
    ref_f32 = (jax.nn.sigmoid(x.reshape(1, -1) @ w_enc.T + b_enc) @ w_dec.T + b_dec
               ).reshape(x.shape)
    assert jnp.allclose(out, ref_f32, atol=5e-2, rtol=5e-2)

    print("KERNEL_OK")
</pallas_src>

<mosaic_0001>
module attributes {stable_mosaic.version = 11 : i64} {
  func.func @_encoder_kernel(%arg0: i32, %arg1: memref<1x256xf32, #tpu.memory_space<vmem>>, %arg2: memref<32x256xbf16, #tpu.memory_space<vmem>>, %arg3: memref<1x32xf32, #tpu.memory_space<vmem>>, %arg4: memref<1x32xf32, #tpu.memory_space<vmem>>, %arg5: memref<1x32xf32, #tpu.memory_space<vmem>>) attributes {dimension_semantics = [#tpu.dimension_semantics<arbitrary>], iteration_bounds = array<i64: 1>, scalar_prefetch = 0 : i64, scratch_operands = 1 : i64, tpu.core_type = #tpu.core_type<tc>, window_params = [{transform_indices = @transform_0, window_bounds = array<i64: 1, 256>}, {transform_indices = @transform_1, window_bounds = array<i64: 32, 256>}, {pipeline_mode = #tpu.pipeline_mode<synchronous>, transform_indices = @transform_2, window_bounds = array<i64: 1, 32>}, {pipeline_mode = #tpu.pipeline_mode<synchronous>, transform_indices = @transform_3, window_bounds = array<i64: 1, 32>}]} {
    %c0_i32 = arith.constant 0 : i32
    %0 = arith.cmpi eq, %arg0, %c0_i32 : i32
    %1 = arith.extui %0 : i1 to i32
    %c0_i32_0 = arith.constant 0 : i32
    %2 = arith.cmpi ne, %1, %c0_i32_0 : i32
    scf.if %2 {
      %cst_10 = arith.constant 0.000000e+00 : f32
      %13 = vector.broadcast %cst_10 : f32 to vector<1x32xf32>
      %c0_11 = arith.constant 0 : index
      %c0_12 = arith.constant 0 : index
      %14 = vector.load %arg5[%c0_11, %c0_12] : memref<1x32xf32, #tpu.memory_space<vmem>>, vector<1x32xf32>
      tpu.vector_store %arg5[%c0_11, %c0_12], %13 {strides = array<i32>} : memref<1x32xf32, #tpu.memory_space<vmem>>, vector<1x32xf32>,
    } else {
    }
    %c0 = arith.constant 0 : index
    %c0_1 = arith.constant 0 : index
    %3 = vector.load %arg1[%c0, %c0_1] : memref<1x256xf32, #tpu.memory_space<vmem>>, vector<1x256xf32>
    %4 = arith.truncf %3 : vector<1x256xf32> to vector<1x256xbf16>
    %c0_2 = arith.constant 0 : index
    %c0_3 = arith.constant 0 : index
    %5 = vector.load %arg5[%c0_2, %c0_3] : memref<1x32xf32, #tpu.memory_space<vmem>>, vector<1x32xf32>
    %c0_4 = arith.constant 0 : index
    %c0_5 = arith.constant 0 : index
    %6 = vector.load %arg2[%c0_4, %c0_5] : memref<32x256xbf16, #tpu.memory_space<vmem>>, vector<32x256xbf16>
    %cst = arith.constant dense<0.000000e+00> : vector<1x32xf32>
    %7 = tpu.matmul %4, %6, %cst {dimension_numbers = #tpu.dot_dimension_numbers<[1], [1], [0], [0], [0, 0, 1, 0], [], []>} : vector<1x256xbf16>, vector<32x256xbf16>, vector<1x32xf32> -> vector<1x32xf32>
    %8 = arith.addf %5, %7 : vector<1x32xf32>
    %c0_6 = arith.constant 0 : index
    %c0_7 = arith.constant 0 : index
    %9 = vector.load %arg5[%c0_6, %c0_7] : memref<1x32xf32, #tpu.memory_space<vmem>>, vector<1x32xf32>
    tpu.vector_store %arg5[%c0_6, %c0_7], %8 {strides = array<i32>} : memref<1x32xf32, #tpu.memory_space<vmem>>, vector<1x32xf32>,
    %c0_i32_8 = arith.constant 0 : i32
    %10 = arith.cmpi eq, %arg0, %c0_i32_8 : i32
    %11 = arith.extui %10 : i1 to i32
    %c0_i32_9 = arith.constant 0 : i32
    %12 = arith.cmpi ne, %11, %c0_i32_9 : i32
    scf.if %12 {
      %c0_10 = arith.constant 0 : index
      %c0_11 = arith.constant 0 : index
      %13 = vector.load %arg5[%c0_10, %c0_11] : memref<1x32xf32, #tpu.memory_space<vmem>>, vector<1x32xf32>
      %c0_12 = arith.constant 0 : index
      %c0_13 = arith.constant 0 : index
      %14 = vector.load %arg3[%c0_12, %c0_13] : memref<1x32xf32, #tpu.memory_space<vmem>>, vector<1x32xf32>
      %15 = arith.addf %13, %14 : vector<1x32xf32>
      %cst_14 = arith.constant 0.000000e+00 : f32
      %16 = vector.broadcast %cst_14 : f32 to vector<1x32xf32>
      %17 = arith.subf %16, %15 : vector<1x32xf32>
      %18 = math.exp %17 : vector<1x32xf32>
      %cst_15 = arith.constant 1.000000e+00 : f32
      %19 = vector.broadcast %cst_15 : f32 to vector<1x32xf32>
      %20 = arith.addf %19, %18 : vector<1x32xf32>
      %21 = tpu.reciprocal %20 {approx = true} : vector<1x32xf32> -> vector<1x32xf32>
      %c0_16 = arith.constant 0 : index
      %c0_17 = arith.constant 0 : index
      %22 = vector.load %arg4[%c0_16, %c0_17] : memref<1x32xf32, #tpu.memory_space<vmem>>, vector<1x32xf32>
      tpu.vector_store %arg4[%c0_16, %c0_17], %21 {strides = array<i32>} : memref<1x32xf32, #tpu.memory_space<vmem>>, vector<1x32xf32>,
    } else {
    }
    return
  }
  func.func @transform_0(%arg0: i32) -> (i32, i32) {
    %c0_i32 = arith.constant 0 : i32
    %c0_i32_0 = arith.constant 0 : i32
    return %c0_i32, %arg0 : i32, i32
  }
  func.func @transform_1(%arg0: i32) -> (i32, i32) {
    %c0_i32 = arith.constant 0 : i32
    %c0_i32_0 = arith.constant 0 : i32
    return %c0_i32, %arg0 : i32, i32
  }
  func.func @transform_2(%arg0: i32) -> (i32, i32) {
    %c0_i32 = arith.constant 0 : i32
    %c0_i32_0 = arith.constant 0 : i32
    %c0_i32_1 = arith.constant 0 : i32
    return %c0_i32, %c0_i32_0 : i32, i32
  }
  func.func @transform_3(%arg0: i32) -> (i32, i32) {
    %c0_i32 = arith.constant 0 : i32
    %c0_i32_0 = arith.constant 0 : i32
    %c0_i32_1 = arith.constant 0 : i32
    return %c0_i32, %c0_i32_0 : i32, i32
  }
}

</mosaic_0001>

<bundles_post_ra>
// kernel: tpu_custom_call.1
= control target key start
LH: loop header
LB: loop body
LE: loop exit
PB: predicated region body
PF: predicated region fallthrough
CT: control target
= control target key end

     0   :  { %8 = vsyncpa [#allocation4], 0  ;;  %s325_s0 = inlined_call_operand.hbm [shape: f32[1,256], index: 0, kind: input, shape index: {}]   ;;  %s326_s1 = inlined_call_operand.hbm [shape: bf16[32,256], index: 1, kind: input, shape index: {}]   ;;  %s327_s2 = inlined_call_operand.vmem [shape: f32[1,32], index: 2, kind: input, shape index: {}]   ;;  %s328_s3 = inlined_call_operand.hbm [shape: f32[1,32], index: 3, kind: output, shape index: {}]  }
   0x1   :  { %9 = vsyncpa [#allocation7], 0 }
   0x2   :  { %10 = vsyncpa [#allocation5], 0  ;;  %s250_s12 = smov [#allocation3]   ;;  %s251_s14 = smov [#allocation6]  }
   0x3   :  { %s17_s13 = sshll.u32 %s250_s12, 4  ;;  %s26_s15 = sshll.u32 %s251_s14, 4  ;;  %s18_s13 = int_to_ptr.vmem [resolvable:$true] %s17_s13  ;;  %s276_s15 = int_to_ptr.vmem [resolvable:$true] %s26_s15 }
   0x4   :  { %s178_s18 = scalar_lea.hbm %s325_s0, 32 }
   0x5   :  { %p179_p0 = scmp.ne.s32.totalorder %s325_s0, %s178_s18  ;;  %p182_p1 = scmp.lt.u32.totalorder %s178_s18, %s325_s0 }
   0x7   :  { %p184_p2 = pnand %p182_p1, %p179_p0 }
   0x9   :  { %187 = shalt.err (!%p184_p2)
}
   0xa   :  { %s188_s23 = scalar_lea.vmem %s18_s13, 32  ;;  %p193_p4 = scmp.lt.s32.totalorder %s18_s13, %s18_s13 }
   0xb   :  { %p189_p3 = scmp.ne.s32.totalorder %s18_s13, %s188_s23  ;;  %p194_p5 = scmp.lt.s32.totalorder %s188_s23, %s188_s23 }
   0xd   :  { %p195_p6 = por %p194_p5, %p193_p4 }
   0xf   :  { %p196_p7 = pnand %p195_p6, %p189_p3 }
  0x11   :  { %199 = shalt.err (!%p196_p7)
}
  0x12   :  { %20 = dma.hbm_to_vmem [thread:$0]  %s325_s0, 32, %s18_s13, [#allocation4]  }
  0x13   :  { %s200_s28 = scalar_lea.hbm %s326_s1, 512 }
  0x14   :  { %p201_p8 = scmp.ne.s32.totalorder %s326_s1, %s200_s28  ;;  %p204_p9 = scmp.lt.u32.totalorder %s200_s28, %s326_s1 }
  0x16   :  { %p206_p10 = pnand %p204_p9, %p201_p8 }
  0x18   :  { %209 = shalt.err (!%p206_p10)
}
  0x19   :  { %s210_s6 = scalar_lea.vmem %s276_s15, 512  ;;  %p215_p12 = scmp.lt.s32.totalorder %s276_s15, %s276_s15 }
  0x1a   :  { %p211_p11 = scmp.ne.s32.totalorder %s276_s15, %s210_s6  ;;  %p216_p13 = scmp.lt.s32.totalorder %s210_s6, %s210_s6 }
  0x1c   :  { %p217_p0 = por %p216_p13, %p215_p12 }
  0x1e   :  { %p218_p1 = pnand %p217_p0, %p211_p11 }
  0x20   :  { %221 = shalt.err (!%p218_p1)
}
  0x21   :  { %s252_s0 = smov 128   ;;  %s253_s7 = smov 8  }
  0x22   :  { %32 = dma.hbm_to_vmem [thread:$0]  %s326_s1, 512, %s276_s15, [#allocation7], %s252_s0, %s252_s0, %s253_s7  }
  0x23   :  { %244 = dma.done.wait [#allocation4], 32  }
  0x24   :  { %245 = vsyncadd [#allocation4], 4294967264 }
  0x25   :  { %246 = dma.done.wait [#allocation7], 512  }
  0x26   :  { %247 = vsyncadd [#allocation7], 4294966784  ;;  %v50_v0 = vlaneseq  ;;  %vm46_vm0 = vcmask 253952   ;;  %v254_v1 = vmov 0.0   ;;  %v168_v4 = vld [vmem:[#allocation6 + $0x4] ss:$8 sps:$4 sm:$0xff]  }
  0x27   :  { %47 = vst.msk [vmem:[#allocation2] sm:$0x1] %vm46_vm0, %v254_v1  ;;  %v170_v5 = vld [vmem:[#allocation6] ss:$8 sps:$4 sm:$0xff]   ;;  %87 = vmatprep.subr.bf16.mxu0 %v168_v4  ;;  %v171_v6 = vld [vmem:[#allocation6 + $0x14] ss:$8 sps:$4 sm:$0xff]  }
  0x28   :  { %v51_v2 = vshrl.u32 %v50_v0, 7  ;;  %v48_v7 = vld [vmem:[#allocation3] sm:$0x3]  ;;  %88 = vmatpush1.bf16.xpose.msra.mxu0 %v170_v5  ;;  %v173_v11 = vld [vmem:[#allocation6 + $0x10] ss:$8 sps:$4 sm:$0xff]   ;;  %s255_s11 = smov [#allocation8]  }
  0x29   :  { %89 = vmatprep.subr.bf16.mxu0 %v171_v6  ;;  %v134_v20 = vld [vmem:[%s327_s2] sm:$0x1]  ;;  %s148_s12 = sshll.u32 %s255_s11, 4  ;;  %s149_s12 = int_to_ptr.vmem [resolvable:$true] %s148_s12 }
  0x2a   :  { %v56_v3 = vsub.s32 1, %v51_v2  ;;  %v52_v10 = vsub.s32 0, %v51_v2  ;;  %s222_s13 = scalar_lea.vmem %s149_s12, 16  ;;  %s226_s14 = scalar_lea.vmem %s149_s12, 32 }
  0x2b   :  { %p223_p2 = scmp.ne.s32.totalorder %s149_s12, %s222_s13  ;;  %p227_p3 = scmp.lt.s32.totalorder %s149_s12, %s149_s12 }
  0x2c   :  { %v57_v8 = vrot.slane %v48_v7, %v56_v3  ;;  %v53_v12 = vrot.slane %v48_v7, %v52_v10  ;;  %p228_p4 = scmp.lt.s32.totalorder %s226_s14, %s222_s13 }
  0x2e   :  { %v61_v9 = vpack.c.bf16 %v57_v8, %v57_v8  ;;  %v60_v13 = vpack.c.bf16 %v53_v12, %v53_v12  ;;  %v62_v14 = vld [vmem:[#allocation2] sm:$0x1]  ;;  %p229_p5 = por %p228_p4, %p227_p3 }
  0x30   :  { %119 = vmatprep.mubr.bf16.mxu0 %v61_v9  ;;  %90 = vmatpush1.bf16.xpose.msra.mxu0 %v173_v11  ;;  %p230_p6 = pnand %p229_p5, %p223_p2 }
  0x37   :  { %120 = vmatmul.mubr.bf16.vlgmr.msra.gmra.mrb[0].mxu0 %v60_v13 }
 0x10a   :  { %v121_v15 = vpop.f32.mrb[0].mxu0 }
 0x10b   :  { %v127_v16 = vadd.f32 %v121_v15, %v62_v14  ;;  %v123_v17 = vpop.f32.mrb[1].mxu0 }
 0x10c   :  { %v124_v18 = vpop.f32.mrb[2].mxu0 }
 0x10d   :  { %129 = vst.msk [vmem:[#allocation2] sm:$0x1] %vm46_vm0, %v127_v16  ;;  %v125_v19 = vpop.f32.mrb[3].mxu0 }
 0x114   :  { %v133_v21 = vld [vmem:[#allocation2] sm:$0x1] }
 0x115   :  { %v135_v22 = vadd.f32 %v134_v20, %v133_v21 }
 0x117   :  { %v136_v23 = vsub.f32 0.0, %v135_v22 }
 0x119   :  { %v137_v24 = vmul.f32 1.442695, %v136_v23 }
 0x11b   :  { %174 = vpow2.f32 %v137_v24 }
 0x125   :  { %v175_v25 = vpop.eup %174 }
 0x126   :  { %v139_v26 = vadd.f32 1.0, %v175_v25 }
 0x128   :  { %176 = vrcp.f32 %v139_v26 }
 0x132   :  { %v177_v27 = vpop.eup %176 }
 0x133   :  { %141 = vst.msk [vmem:[#allocation8] sm:$0x1] %vm46_vm0, %v177_v27 }
 0x134   :  { %233 = shalt.err (!%p230_p6)
}
 0x135   :  { %s234_s16 = scalar_lea.hbm %s328_s3, 16 }
 0x136   :  { %p235_p7 = scmp.ne.s32.totalorder %s328_s3, %s234_s16  ;;  %p238_p8 = scmp.lt.u32.totalorder %s234_s16, %s328_s3 }
 0x138   :  { %p240_p9 = pnand %p238_p8, %p235_p7 }
 0x13a   :  { %243 = shalt.err (!%p240_p9)
}
 0x13b   :  { %151 = dma.vmem_to_hbm [thread:$0]  %s149_s12, 16, %s328_s3, [#allocation5]  }
 0x13c   :  { %248 = dma.done.wait [#allocation5], 16  }
 0x13d   :  { %249 = vsyncadd [#allocation5], 4294967280 }
 0x13e   :  { %155 = vsyncpa [#allocation4], 1 }
 0x13f   :  { %156 = vsyncpa [#allocation7], 1 }
 0x140   :  { %157 = vsyncpa [#allocation5], 1 }

</bundles_post_ra>
